<compile_context>
chip_gen: v6e
topology: v6e:2x2x1
jax: 0.10.0
libtpu: 0.0.40
codegen_flags: <defaults>
</compile_context>

<pallas_src>
import math
import functools

import jax
import jax.numpy as jnp
from jax.experimental import pallas as pl
from jax.experimental.pallas import tpu as pltpu


_PARALLEL = pltpu.CompilerParams(dimension_semantics=("parallel",))
_ARBITRARY = pltpu.CompilerParams(dimension_semantics=("arbitrary",))


def _row_tile(n):
    for t in (256, 128, 64, 32, 16, 8):
        if n % t == 0:
            return t
    return n


def _layer_norm(x, gamma, beta, eps=1e-5):
    mu = jnp.mean(x, axis=-1, keepdims=True)
    var = jnp.mean((x - mu) ** 2, axis=-1, keepdims=True)
    return (x - mu) * jax.lax.rsqrt(var + eps) * gamma + beta


# ----------------------------------------------------------------------------
# Pallas kernels
# ----------------------------------------------------------------------------

def embed_pe_kernel(scale, src_ref, pe_ref, o_ref):
    # src * sqrt(emsize) + positional encoding; pe block is shared by all batches.
    o_ref[...] = src_ref[...] * scale + pe_ref[...]


def qkv_proj_kernel(x_ref, w_ref, b_ref, o_ref):
    # fused Q/K/V projection: one (TM,E) x (E,3E) matmul + one bias add.
    o_ref[...] = jnp.dot(x_ref[...], w_ref[...],
                         preferred_element_type=jnp.float32) + b_ref[...]


def attention_kernel(scale, q_ref, k_ref, v_ref, bias_ref, o_ref, attn_ref):
    # one batch element per grid step; all heads batched via einsum (no loops).
    q = q_ref[0] * scale                      # (H, L, Dh)
    k = k_ref[0]                              # (H, L, Dh)
    v = v_ref[0]                              # (H, L, Dh)
    s = jnp.einsum('hld,hmd->hlm', q, k,
                   preferred_element_type=jnp.float32)          # (H, L, L)
    s = s + bias_ref[...]                     # combined attn-mask + key-pad bias
    s = s - jnp.max(s, axis=-1, keepdims=True)
    p = jnp.exp(s)
    denom = jnp.sum(p, axis=-1, keepdims=True)
    p = p * pl.reciprocal(denom, approx=True)                   # divide -> EUP
    attn_ref[0] = jnp.mean(p, axis=0)         # head-averaged attention weights
    o_ref[0] = jnp.einsum('hlm,hmd->hld', p, v,
                          preferred_element_type=jnp.float32)   # (H, L, Dh)


def out_ffn_kernel(x_ref, ao_ref, wo_ref, bo_ref, w1_ref, b1_ref,
                   w2_ref, b2_ref, g1_ref, be1_ref, g2_ref, be2_ref, y_ref):
    # out-projection + residual + LN1 + ReLU FFN + residual + LN2 (post-norm).
    x = x_ref[...]
    ao = jnp.dot(ao_ref[...], wo_ref[...],
                 preferred_element_type=jnp.float32) + bo_ref[...]
    h1 = _layer_norm(x + ao, g1_ref[...], be1_ref[...])
    ff = jnp.maximum(jnp.dot(h1, w1_ref[...],
                             preferred_element_type=jnp.float32) + b1_ref[...], 0.0)
    ff = jnp.dot(ff, w2_ref[...], preferred_element_type=jnp.float32) + b2_ref[...]
    y_ref[...] = _layer_norm(h1 + ff, g2_ref[...], be2_ref[...])


def head_logits_kernel(h_ref, w_ref, b_ref, logits_ref, lse_ref, m_sc, l_sc):
    # vocab-tiled hidden2token with online logsumexp (flash-style).
    j = pl.program_id(0)

    @pl.when(j == 0)
    def _():
        m_sc[...] = jnp.full_like(m_sc, -jnp.inf)
        l_sc[...] = jnp.zeros_like(l_sc)

    z = jnp.dot(h_ref[...], w_ref[...],
                preferred_element_type=jnp.float32) + b_ref[...]
    logits_ref[...] = z
    m_new = jnp.maximum(m_sc[...], jnp.max(z, axis=-1, keepdims=True))
    l_sc[...] = (l_sc[...] * jnp.exp(m_sc[...] - m_new)
                 + jnp.sum(jnp.exp(z - m_new), axis=-1, keepdims=True))
    m_sc[...] = m_new

    @pl.when(j == pl.num_programs(0) - 1)
    def _():
        lse_ref[...] = m_sc[...] + jnp.log(l_sc[...])


def log_softmax_norm_kernel(logits_ref, lse_ref, o_ref):
    o_ref[...] = logits_ref[...] - lse_ref[...]


def mlp_kernel(h_ref, w1_ref, b1_ref, w2_ref, b2_ref, o_ref):
    # recommender MLP: sigmoid(Linear) -> Linear -> scalar rating
    z = jnp.dot(h_ref[...], w1_ref[...],
                preferred_element_type=jnp.float32) + b1_ref[...]
    s = 1.0 / (1.0 + jnp.exp(-z))
    o_ref[...] = jnp.dot(s, w2_ref[...],
                         preferred_element_type=jnp.float32) + b2_ref[...]


# ----------------------------------------------------------------------------
# Wrappers (pallas_call glue)
# ----------------------------------------------------------------------------

def run_embed_pe(src_bm, pe, emsize):
    B, L, E = src_bm.shape
    return pl.pallas_call(
        functools.partial(embed_pe_kernel, math.sqrt(emsize)),
        grid=(B,),
        in_specs=[pl.BlockSpec((1, L, E), lambda b: (b, 0, 0)),
                  pl.BlockSpec((L, E), lambda b: (0, 0))],      # pe shared, never tiled
        out_specs=pl.BlockSpec((1, L, E), lambda b: (b, 0, 0)),
        out_shape=jax.ShapeDtypeStruct((B, L, E), jnp.float32),
        compiler_params=_PARALLEL,
    )(src_bm, pe)


def run_qkv_proj(x2, wqkv, bqkv, TM):
    N, E = x2.shape
    E3 = wqkv.shape[1]
    return pl.pallas_call(
        qkv_proj_kernel,
        grid=(N // TM,),
        in_specs=[pl.BlockSpec((TM, E), lambda i: (i, 0)),
                  pl.BlockSpec((E, E3), lambda i: (0, 0)),
                  pl.BlockSpec((1, E3), lambda i: (0, 0))],
        out_specs=pl.BlockSpec((TM, E3), lambda i: (i, 0)),
        out_shape=jax.ShapeDtypeStruct((N, E3), jnp.float32),
        compiler_params=_PARALLEL,
    )(x2, wqkv, bqkv)


def run_attention(q, k, v, bias, scale):
    B, H, L, Dh = q.shape
    qspec = pl.BlockSpec((1, H, L, Dh), lambda b: (b, 0, 0, 0))
    o, attn = pl.pallas_call(
        functools.partial(attention_kernel, scale),
        grid=(B,),
        in_specs=[qspec, qspec, qspec,
                  pl.BlockSpec((1, L, L), lambda b: (b, 0, 0))],
        out_specs=(pl.BlockSpec((1, H, L, Dh), lambda b: (b, 0, 0, 0)),
                   pl.BlockSpec((1, L, L), lambda b: (b, 0, 0))),
        out_shape=(jax.ShapeDtypeStruct((B, H, L, Dh), jnp.float32),
                   jax.ShapeDtypeStruct((B, L, L), jnp.float32)),
        compiler_params=_PARALLEL,
    )(q, k, v, bias)
    return o, attn


def run_out_ffn(x2, ao2, p, TM):
    N, E = x2.shape
    nhid = p['w1'].shape[1]
    const = lambda i: (0, 0)
    return pl.pallas_call(
        out_ffn_kernel,
        grid=(N // TM,),
        in_specs=[pl.BlockSpec((TM, E), lambda i: (i, 0)),
                  pl.BlockSpec((TM, E), lambda i: (i, 0)),
                  pl.BlockSpec((E, E), const), pl.BlockSpec((1, E), const),
                  pl.BlockSpec((E, nhid), const), pl.BlockSpec((1, nhid), const),
                  pl.BlockSpec((nhid, E), const), pl.BlockSpec((1, E), const),
                  pl.BlockSpec((1, E), const), pl.BlockSpec((1, E), const),
                  pl.BlockSpec((1, E), const), pl.BlockSpec((1, E), const)],
        out_specs=pl.BlockSpec((TM, E), lambda i: (i, 0)),
        out_shape=jax.ShapeDtypeStruct((N, E), jnp.float32),
        compiler_params=_PARALLEL,
    )(x2, ao2, p['wo'], p['bo'], p['w1'], p['b1'], p['w2'], p['b2'],
      p['g1'], p['be1'], p['g2'], p['be2'])


def run_encoder_layer(x, bias, p, B, L, H, E):
    """One post-norm TransformerEncoderLayer; returns (y, head-averaged attn)."""
    Dh = E // H
    N = B * L
    TM = _row_tile(N)
    x2 = x.reshape(N, E)

    qkv = run_qkv_proj(x2, p['wqkv'], p['bqkv'], TM)            # (N, 3E)
    qkv = qkv.reshape(B, L, 3, H, Dh)                           # wrapper-side layout
    q = jnp.transpose(qkv[:, :, 0], (0, 2, 1, 3))               # (B, H, L, Dh)
    k = jnp.transpose(qkv[:, :, 1], (0, 2, 1, 3))
    v = jnp.transpose(qkv[:, :, 2], (0, 2, 1, 3))

    o, attn = run_attention(q, k, v, bias, 1.0 / math.sqrt(Dh))
    ao2 = jnp.transpose(o, (0, 2, 1, 3)).reshape(N, E)          # concat heads, lane-dense

    y = run_out_ffn(x2, ao2, p, TM)                             # (N, E)
    return y.reshape(B, L, E), attn


def run_head(h, p):
    """Merged hidden2token + log_softmax for all requested rows at once."""
    n, E = h.shape
    ntoken = p['w'].shape[1]
    if ntoken % 512 == 0:
        TN = 512
    elif ntoken % 128 == 0:
        TN = 128
    else:
        TN = ntoken
    nvt = ntoken // TN

    logits, lse = pl.pallas_call(
        head_logits_kernel,
        grid=(nvt,),
        in_specs=[pl.BlockSpec((n, E), lambda j: (0, 0)),
                  pl.BlockSpec((E, TN), lambda j: (0, j)),      # weight streamed once
                  pl.BlockSpec((1, TN), lambda j: (0, j))],
        out_specs=(pl.BlockSpec((n, TN), lambda j: (0, j)),
                   pl.BlockSpec((n, 1), lambda j: (0, 0))),
        out_shape=(jax.ShapeDtypeStruct((n, ntoken), jnp.float32),
                   jax.ShapeDtypeStruct((n, 1), jnp.float32)),
        scratch_shapes=[pltpu.VMEM((n, 1), jnp.float32),
                        pltpu.VMEM((n, 1), jnp.float32)],
        compiler_params=_ARBITRARY,
    )(h, p['w'], p['b'])

    logp = pl.pallas_call(
        log_softmax_norm_kernel,
        grid=(nvt,),
        in_specs=[pl.BlockSpec((n, TN), lambda j: (0, j)),
                  pl.BlockSpec((n, 1), lambda j: (0, 0))],
        out_specs=pl.BlockSpec((n, TN), lambda j: (0, j)),
        out_shape=jax.ShapeDtypeStruct((n, ntoken), jnp.float32),
        compiler_params=_PARALLEL,
    )(logits, lse)
    return logp


def run_mlp(h, p):
    return pl.pallas_call(
        mlp_kernel,
        out_shape=jax.ShapeDtypeStruct((h.shape[0], 1), jnp.float32),
    )(h, p['w1'], p['b1'], p['w2'], p['b2'])


# ----------------------------------------------------------------------------
# PETER forward
# ----------------------------------------------------------------------------

def generate_peter_mask(total_len):
    # True = masked (disallowed); causal mask with user<->item link at (0,1).
    m = jnp.triu(jnp.ones((total_len, total_len), dtype=bool), k=1)
    m = m.at[0, 1].set(False)
    return m


def peter_forward(params, user, item, text, cfg):
    E, H, nlayers = cfg['emsize'], cfg['nhead'], cfg['nlayers']
    src_len, pad_idx = cfg['src_len'], cfg['pad_idx']
    B = user.shape[0]
    L = 2 + text.shape[0]                                       # ui_len + text rows

    # --- embeddings (gather in plain JAX glue) -------------------------------
    u_src = params['user_emb'][user]                            # (B, E)
    i_src = params['item_emb'][item]                            # (B, E)
    w_src = params['word_emb'][text]                            # (L-2, B, E)
    src = jnp.concatenate([u_src[None], i_src[None], w_src], axis=0)    # (L, B, E)
    src_bm = jnp.transpose(src, (1, 0, 2))                      # (B, L, E) batch-major

    x = run_embed_pe(src_bm, params['pe'][:L], E)               # scale + pos-enc

    # --- masks (combined once, reused by every layer) -------------------------
    big_neg = float(jnp.finfo(jnp.float32).min) / 4.0           # dtype-derived, safe sum
    attn_mask = generate_peter_mask(L)
    mask_bias = jnp.where(attn_mask, big_neg, 0.0).astype(jnp.float32)       # (L, L)
    kpm = jnp.concatenate(
        [jnp.zeros((B, 2), dtype=bool), (text.T == pad_idx)], axis=1)        # (B, L)
    kpm_bias = jnp.where(kpm, big_neg, 0.0).astype(jnp.float32)
    bias = mask_bias[None, :, :] + kpm_bias[:, None, :]                      # (B, L, L)

    # --- transformer encoder ---------------------------------------------------
    attns = []
    for layer_p in params['layers']:
        x, attn = run_encoder_layer(x, bias, layer_p, B, L, H, E)
        attns.append(attn)
    attns = jnp.stack(attns)                                    # (nlayers, B, L, L)

    hidden = x                                                  # (B, L, E) batch-major

    # --- prediction heads -------------------------------------------------------
    # rating: hidden[0] (user position) -> MLP -> (B,)
    rating = run_mlp(hidden[:, 0, :], params['mlp']).reshape(B)

    # context + seq heads share one hidden2token pass (weight streamed once).
    tgt = L - src_len
    h_ctx = hidden[:, 1, :]                                     # (B, E)
    h_seq = jnp.transpose(hidden[:, src_len:, :], (1, 0, 2)).reshape(tgt * B, E)
    logp = run_head(jnp.concatenate([h_ctx, h_seq], axis=0), params['h2t'])
    log_context_dis = logp[:B]                                  # (B, ntoken)
    log_word_prob = logp[B:].reshape(tgt, B, -1)                # (tgt, B, ntoken)

    return {'word': log_word_prob, 'context': log_context_dis,
            'rating': rating, 'attns': attns}


# ----------------------------------------------------------------------------
# Deterministic parameter init (synthetic; shapes follow PETER.__init__)
# ----------------------------------------------------------------------------

def init_params(key, nuser, nitem, ntoken, E, H, nhid, nlayers, pad_idx,
                max_len=512, mlp_hidden=400):
    ks = iter(jax.random.split(key, 64))

    def u(shape, scale=0.1):
        return jax.random.uniform(next(ks), shape, jnp.float32, -scale, scale)

    params = {
        'user_emb': u((nuser, E)),
        'item_emb': u((nitem, E)).at[pad_idx].set(0.0),         # padding_idx row = 0
        'word_emb': u((ntoken, E)).at[pad_idx].set(0.0),
        'h2t': {'w': u((E, ntoken)), 'b': jnp.zeros((1, ntoken), jnp.float32)},
        'mlp': {'w1': u((E, mlp_hidden)), 'b1': jnp.zeros((1, mlp_hidden), jnp.float32),
                'w2': u((mlp_hidden, 1)), 'b2': jnp.zeros((1, 1), jnp.float32)},
    }

    # sinusoidal positional encoding table
    pos = jnp.arange(max_len, dtype=jnp.float32)[:, None]
    div = jnp.exp(jnp.arange(0, E, 2, dtype=jnp.float32) * (-math.log(10000.0) / E))
    ang = pos * div
    pe = jnp.zeros((max_len, E), jnp.float32)
    pe = pe.at[:, 0::2].set(jnp.sin(ang)).at[:, 1::2].set(jnp.cos(ang))
    params['pe'] = pe

    layers = []
    for _ in range(nlayers):
        layers.append({
            # fused Q/K/V: columns laid out as [q | k | v]
            'wqkv': u((E, 3 * E)), 'bqkv': jnp.zeros((1, 3 * E), jnp.float32),
            'wo': u((E, E)), 'bo': jnp.zeros((1, E), jnp.float32),
            'w1': u((E, nhid)), 'b1': jnp.zeros((1, nhid), jnp.float32),
            'w2': u((nhid, E)), 'b2': jnp.zeros((1, E), jnp.float32),
            'g1': jnp.ones((1, E), jnp.float32), 'be1': jnp.zeros((1, E), jnp.float32),
            'g2': jnp.ones((1, E), jnp.float32), 'be2': jnp.zeros((1, E), jnp.float32),
        })
    params['layers'] = layers
    return params


# ----------------------------------------------------------------------------

if __name__ == "__main__":
    # small, self-consistent shapes
    cfg = dict(emsize=32, nhead=2, nhid=64, nlayers=2,
               src_len=2, tgt_len=6, pad_idx=0)
    nuser, nitem, ntoken = 16, 16, 128
    B = 2
    E = cfg['emsize']

    key = jax.random.PRNGKey(0)
    kp, ku, ki, kt = jax.random.split(key, 4)

    params = init_params(kp, nuser, nitem, ntoken, E, cfg['nhead'],
                         cfg['nhid'], cfg['nlayers'], cfg['pad_idx'])

    user = jax.random.randint(ku, (B,), 0, nuser)               # (B,) int
    item = jax.random.randint(ki, (B,), 1, nitem)               # (B,) int (non-pad)
    text = jax.random.randint(kt, (cfg['tgt_len'], B), 1, ntoken)    # (tgt_len, B)
    text = text.at[-1, 0].set(cfg['pad_idx'])                   # exercise key padding

    # TODO(synk): generate()/predict() (host-side topk + .tolist()) and mask
    # plotting are host utilities, not part of the TPU forward pass.
    out = peter_forward(params, user, item, text, cfg)
    jax.block_until_ready(out)

    L = 2 + cfg['tgt_len']
    assert out['word'].shape == (L - cfg['src_len'], B, ntoken)
    assert out['context'].shape == (B, ntoken)
    assert out['rating'].shape == (B,)
    assert out['attns'].shape == (cfg['nlayers'], B, L, L)

    print("KERNEL_OK")
</pallas_src>

<mosaic_0001>
module attributes {stable_mosaic.version = 11 : i64} {
  func.func @embed_pe_kernel(%arg0: i32, %arg1: memref<1x8x32xf32, #tpu.memory_space<vmem>>, %arg2: memref<8x32xf32, #tpu.memory_space<vmem>>, %arg3: memref<1x8x32xf32, #tpu.memory_space<vmem>>) attributes {dimension_semantics = [#tpu.dimension_semantics<parallel>], iteration_bounds = array<i64: 2>, scalar_prefetch = 0 : i64, scratch_operands = 0 : i64, tpu.core_type = #tpu.core_type<tc>, window_params = [{transform_indices = @transform_0, window_bounds = array<i64: 1, 8, 32>}, {pipeline_mode = #tpu.pipeline_mode<synchronous>, transform_indices = @transform_1, window_bounds = array<i64: 8, 32>}, {transform_indices = @transform_2, window_bounds = array<i64: 1, 8, 32>}]} {
    %c0 = arith.constant 0 : index
    %c0_0 = arith.constant 0 : index
    %c0_1 = arith.constant 0 : index
    %0 = vector.load %arg1[%c0, %c0_0, %c0_1] : memref<1x8x32xf32, #tpu.memory_space<vmem>>, vector<1x8x32xf32>
    %cst = arith.constant 5.65685415 : f32
    %1 = vector.broadcast %cst : f32 to vector<1x8x32xf32>
    %2 = arith.mulf %0, %1 : vector<1x8x32xf32>
    %c0_2 = arith.constant 0 : index
    %c0_3 = arith.constant 0 : index
    %3 = vector.load %arg2[%c0_2, %c0_3] : memref<8x32xf32, #tpu.memory_space<vmem>>, vector<8x32xf32>
    %4 = vector.shape_cast %3 : vector<8x32xf32> to vector<1x8x32xf32>
    %5 = arith.addf %2, %4 : vector<1x8x32xf32>
    %c0_4 = arith.constant 0 : index
    %c0_5 = arith.constant 0 : index
    %c0_6 = arith.constant 0 : index
    %6 = vector.load %arg3[%c0_4, %c0_5, %c0_6] : memref<1x8x32xf32, #tpu.memory_space<vmem>>, vector<1x8x32xf32>
    tpu.vector_store %arg3[%c0_4, %c0_5, %c0_6], %5 {strides = array<i32>} : memref<1x8x32xf32, #tpu.memory_space<vmem>>, vector<1x8x32xf32>,
    return
  }
  func.func @transform_0(%arg0: i32) -> (i32, i32, i32) {
    %c0_i32 = arith.constant 0 : i32
    %c0_i32_0 = arith.constant 0 : i32
    %c0_i32_1 = arith.constant 0 : i32
    return %arg0, %c0_i32, %c0_i32_0 : i32, i32, i32
  }
  func.func @transform_1(%arg0: i32) -> (i32, i32) {
    %c0_i32 = arith.constant 0 : i32
    %c0_i32_0 = arith.constant 0 : i32
    %c0_i32_1 = arith.constant 0 : i32
    return %c0_i32, %c0_i32_0 : i32, i32
  }
  func.func @transform_2(%arg0: i32) -> (i32, i32, i32) {
    %c0_i32 = arith.constant 0 : i32
    %c0_i32_0 = arith.constant 0 : i32
    %c0_i32_1 = arith.constant 0 : i32
    return %arg0, %c0_i32, %c0_i32_0 : i32, i32, i32
  }
}

</mosaic_0001>

<bundles_post_ra>
// kernel: tpu_custom_call.1
= control target key start
LH: loop header
LB: loop body
LE: loop exit
PB: predicated region body
PF: predicated region fallthrough
CT: control target
= control target key end

     0   :  { %7 = vsyncpa [#allocation3], 0  ;;  %s651_s0 = inlined_call_operand.hbm [shape: f32[2,8,32], index: 0, kind: input, shape index: {}]   ;;  %s652_s1 = inlined_call_operand.hbm [shape: f32[8,32], index: 1, kind: input, shape index: {}]   ;;  %s653_s2 = inlined_call_operand.hbm [shape: f32[2,8,32], index: 2, kind: output, shape index: {}]  }
   0x1   :  { %9 = vsyncpa [#allocation3 + $0x1], 0 }
   0x2   :  { %10 = vsyncpa [#allocation6], 0 }
   0x3   :  { %11 = vsyncpa [#allocation4], 0 }
   0x4   :  { %13 = vsyncpa [#allocation4 + $0x1], 0  ;;  %s485_s9 = smov 0   ;;  %s487_s10 = smov 0  }
   0x5   :  { %s489_s11 = smov 0   ;;  %s491_s12 = smov 0  }
   0x6 LB: > { %s506_s13 = sadd.s32 4294967295, %s465_s12   ;;  %s272_s14 = sadd.s32 4294967294, %s465_s12   ;;  %s465_s12 = sphi %s491_s12, %s676_s12   ;;  %s461_s11 = sphi %s489_s11, %s675_s11   ;;  %s457_s10 = sphi %s487_s10, %s674_s10   ;;  %s453_s9 = sphi %s485_s9, %s673_s9  }
   0x7   : > { %p39_p0 = scmp.ne.s32.totalorder %s457_s10, %s453_s9  ;;  %p654_p1 = scmp.eq.s32.totalorder %s506_s13, 0 }
   0x8   : > { %p90_p3 = scmp.eq.s32.totalorder %s272_s14, 1  ;;  %p273_p5 = scmp.ge.s32.totalorder %s465_s12, 1 }
   0x9   : > { %p515_p4 = por %p654_p1, %p39_p0  ;;  %p97_p7 = scmp.lt.s32.totalorder %s465_s12, 3 }
   0xa   : > { %p520_p6 = por %p90_p3, %p39_p0  ;;  %s467_s18 = smov [#allocation5]  }
   0xb   : > { %s658_s15 = scalar_select %p515_p4, 1, 0 }
   0xc   : > { %s659_s16 = scalar_select %p520_p6, 1, 0 }
   0xd   : > { %p525_p8 = pnand %p273_p5, %p97_p7  ;;  %s110_s19 = sshll.u32 %s467_s18, 4  ;;  %s111_s19 = int_to_ptr.vmem [resolvable:$true] %s110_s19 }
   0xe   : > { %s533_s20 = sadd.s32 1, %s465_s12   ;;  %s26_s24 = sadd.s32 1, %s461_s11 }
   0xf   : > { %s660_s17 = scalar_select %p525_p8, 1, 0 }
  0x10   : > { %p294_p10 = pneg %p525_p8  ;;  %s23_s22 = ssub.s32 %s465_s12, %s533_s20 }
  0x11   : > { %p543_p12 = scmp.eq.s32.totalorder %s23_s22, 0  ;;  %p33_p13 = scmp.ne.s32.totalorder %s461_s11, %s457_s10 }
  0x12   : > { %p537_p11 = pnand %p294_p10, %p654_p1  ;;  %s354_s25 = scalar_lea.vmem %s111_s19, 128 }
  0x13   : > { %p355_p3 = scmp.ne.s32.totalorder %s111_s19, %s354_s25  ;;  %p362_p9 = scmp.lt.s32.totalorder %s111_s19, %s111_s19 }
  0x14   : > { %p345_p0 = pneg %p537_p11  ;;  %p363_p2 = scmp.lt.s32.totalorder %s354_s25, %s354_s25 }
  0x16   : > { %p357_p5 = pnand %p355_p3, %p345_p0  ;;  %p364_p10 = por %p363_p2, %p362_p9 }
  0x18   : > { %p358_p7 = pneg %p357_p5 }
  0x1a   : > { %p365_p1 = pnand %p364_p10, %p358_p7 }
  0x1c   : > { %368 = shalt.err (!%p365_p1)
}
  0x1d   : > { %297 = dma.hbm_to_vmem [thread:$0]  (!%p537_p11), %s652_s1, 128, %s111_s19, [#allocation6]  }
  0x1e   : > { %s560_s28 = scalar_select %p543_p12, %s461_s11, %s26_s24  }
  0x1f   : > { %p34_p1 = scmp.eq.s32.totalorder %s465_s12, 0  ;;  %p663_p2 = scmp.eq.s32.totalorder %s506_s13, 1 }
  0x20   : > { %p307_p0 = scmp.lt.s32.totalorder %s465_s12, 2  ;;  %s121_s30 = sand.u32 1, %s461_s11  }
  0x21   : > { %p568_p9 = por %p663_p2, %p33_p13  ;;  %p35_p3 = por %p34_p1, %p33_p13 }
  0x22   : > { %s276_s3 = sshll.u32 %s121_s30, 3  ;;  %s277_s4 = sshll.u32 %s465_s12, 7 }
  0x23   : > { %s664_s29 = scalar_select %p568_p9, 1, 0 }
  0x24   : > { %s581_s7 = scalar_lea.hbm %s651_s0, %s277_s4  ;;  %s125_s8 = scalar_lea.vmem [#allocation2], %s276_s3 }
  0x25   : > { %s132_s14 = sshll.u32 %s125_s8, 4  ;;  %p583_p11 = pnand %p307_p0, %p35_p3  ;;  %s133_s14 = int_to_ptr.vmem [resolvable:$true] %s132_s14 }
  0x26   : > { %s122_s19 = scalar_lea.sflag [#allocation3], %s121_s30  ;;  %s369_s21 = scalar_lea.hbm %s581_s7, 128 }
  0x27   : > { %p370_p12 = scmp.ne.s32.totalorder %s581_s7, %s369_s21  ;;  %p371_p13 = pneg %p583_p11 }
  0x28   : > { %s374_s24 = scalar_lea.hbm %s651_s0, 256  ;;  %p375_p10 = scmp.lt.s32.totalorder %s581_s7, %s651_s0 }
  0x29   : > { %p372_p5 = pnand %p371_p13, %p370_p12  ;;  %p376_p1 = scmp.lt.s32.totalorder %s374_s24, %s369_s21 }
  0x2b   : > { %p373_p7 = pneg %p372_p5  ;;  %p377_p2 = por %p376_p1, %p375_p10 }
  0x2d   : > { %p378_p0 = pnand %p377_p2, %p373_p7 }
  0x2f   : > { %381 = shalt.err (!%p378_p0)
}
  0x30   : > { %s382_s27 = scalar_lea.vmem %s133_s14, 128  ;;  %s468_s30 = smov [#allocation2]  }
  0x31   : > { %p383_p3 = scmp.ne.s32.totalorder %s133_s14, %s382_s27  ;;  %s387_s3 = sshll.u32 %s468_s30, 4  ;;  %s388_s3 = int_to_ptr.vmem [resolvable:$false] %s387_s3 }
  0x32   : > { %s389_s4 = scalar_lea.vmem %s388_s3, 256  ;;  %p390_p12 = scmp.lt.s32.totalorder %s133_s14, %s388_s3 }
  0x33   : > { %p385_p6 = pnand %p383_p3, %p371_p13  ;;  %p391_p5 = scmp.lt.s32.totalorder %s389_s4, %s382_s27 }
  0x35   : > { %p386_p9 = pneg %p385_p6  ;;  %p392_p4 = por %p391_p5, %p390_p12 }
  0x37   : > { %p393_p8 = pnand %p392_p4, %p386_p9 }
  0x39   : > { %396 = shalt.err (!%p393_p8)
}
  0x3a   : > { %301 = dma.hbm_to_vmem [thread:$0]  (!%p583_p11), %s581_s7, 128, %s133_s14, %s122_s19  }
  0x3b   : > { %p666_p7 = scmp.ne.s32.totalorder %s660_s17, 0 }
  0x3c   : > { %s604_s5 = sand.u32 (!%p666_p7), 1, %s457_s10   ;;  %p667_p6 = scmp.ne.s32.totalorder (!%p666_p7), %s658_s15, 0 }
  0x3d   : > { %141 = sbr.rel (%p666_p7) target bundleno = 95 (0x5f), region = 28  ;;  %s279_s6 = sshll.u32 (!%p666_p7), %s604_s5, 3 }
  0x3e   : > { %s144_s8 = scalar_lea.sflag (!%p666_p7), [#allocation3], %s604_s5  ;;  %s147_s21 = scalar_lea.vmem (!%p666_p7), [#allocation2], %s279_s6 }
  0x42   : > { %440 = dma.done.wait (%p667_p6), %s144_s8, 128  }
  0x43   : > { %442 = vsyncadd (%p667_p6), %s144_s8, 4294967168  ;;  %p668_p4 = scmp.eq.s32.totalorder %s506_s13, 0 }
  0x45   : > { %444 = dma.done.wait (%p668_p4), [#allocation6], 128   ;;  %p669_p8 = pmov %p668_p4 }
  0x46   : > { %v172_v0 = vld [vmem:[%s147_s21] sm:$0xff]  ;;  %v174_v1 = vld [vmem:[#allocation5] sm:$0xff]  ;;  %s171_s17 = scalar_lea.vmem [#allocation7], %s279_s6  ;;  %s283_s14 = sshll.u32 %s506_s13, 7  ;;  %vm176_vm0 = vcmask 261120  }
  0x47   : > { %446 = vsyncadd (%p669_p8), [#allocation6], 4294967168  ;;  %s192_s7 = sshll.u32 %s171_s17, 4  ;;  %v173_v2 = vmul.f32 5.656854, %v172_v0  ;;  %s190_s19 = scalar_lea.hbm %s653_s2, %s283_s14  ;;  %s193_s7 = int_to_ptr.vmem [resolvable:$true] %s192_s7 }
  0x48   : > { %s179_s22 = scalar_lea.sflag [#allocation4], %s604_s5  ;;  %s397_s23 = scalar_lea.vmem %s193_s7, 128 }
  0x49   : > { %v175_v3 = vadd.f32 %v174_v1, %v173_v2  ;;  %p398_p9 = scmp.ne.s32.totalorder %s193_s7, %s397_s23  ;;  %p670_p11 = scmp.ne.s32.totalorder %s664_s29, 0 }
  0x4a   : > { %s469_s24 = smov [#allocation7]  }
  0x4b   : > { %177 = vst.msk [vmem:[%s171_s17] sm:$0xff] %vm176_vm0, %v175_v3  ;;  %p399_p13 = pnand %p398_p9, %p670_p11  ;;  %s401_s25 = sshll.u32 %s469_s24, 4  ;;  %s402_s25 = int_to_ptr.vmem [resolvable:$false] %s401_s25 }
  0x4c   : > { %s403_s26 = scalar_lea.vmem %s402_s25, 256  ;;  %p404_p1 = scmp.lt.s32.totalorder %s193_s7, %s402_s25 }
  0x4d   : > { %p400_p10 = pneg %p399_p13  ;;  %p405_p2 = scmp.lt.s32.totalorder %s403_s26, %s397_s23 }
  0x4f   : > { %p406_p0 = por %p405_p2, %p404_p1 }
  0x51   : > { %p407_p3 = pnand %p406_p0, %p400_p10 }
  0x53   : > { %410 = shalt.err (!%p407_p3)
}
  0x54   : > { %s411_s13 = scalar_lea.hbm %s190_s19, 128  ;;  %s415_s3 = scalar_lea.hbm %s653_s2, 256 }
  0x55   : > { %p412_p12 = scmp.ne.s32.totalorder %s190_s19, %s411_s13  ;;  %p416_p6 = scmp.lt.s32.totalorder %s190_s19, %s653_s2 }
  0x56   : > { %p417_p4 = scmp.lt.s32.totalorder %s415_s3, %s411_s13 }
  0x57   : > { %p413_p5 = pnand %p412_p12, %p670_p11 }
  0x58   : > { %p418_p8 = por %p417_p4, %p416_p6 }
  0x59   : > { %p414_p7 = pneg %p413_p5 }
  0x5b   : > { %p419_p9 = pnand %p418_p8, %p414_p7 }
  0x5d   : > { %422 = shalt.err (!%p419_p9)
}
  0x5e   : > { %292 = dma.vmem_to_hbm [thread:$0]  (%p670_p11), %s193_s7, 128, %s190_s19, %s179_s22  }
  0x5f PF: > { %s204_s6 = sand.u32 1, %s453_s9   ;;  %p671_p13 = scmp.ne.s32.totalorder %s659_s16, 0 }
  0x60   : > { %p672_p10 = scmp.ge.s32.totalorder %s465_s12, 2  ;;  %s205_s8 = scalar_lea.sflag [#allocation4], %s204_s6 }
  0x62   : > { %p303_p1 = pnand %p672_p10, %p671_p13 }
  0x64   : > { %p304_p2 = pneg %p303_p1 }
  0x66   : > { %448 = dma.done.wait (%p304_p2), %s205_s8, 128  }
  0x67   : > { %450 = vsyncadd (%p304_p2), %s205_s8, 4294967168  ;;  %p16_p0 = scmp.ge.s32.totalorder %s533_s20, 4   ;;  %s673_s9 = smov %s457_s10 }
  0x68   : > { %s674_s10 = smov %s461_s11  ;;  %s675_s11 = smov %s560_s28 }
  0x69   : > { %s676_s12 = smov %s533_s20  ;;  %18 = sbr.rel (!%p16_p0) target bundleno = 6 (0x6), region = 77 }
  0x6e   :  { %210 = vsyncpa [#allocation3], 1 }
  0x6f   :  { %212 = vsyncpa [#allocation3 + $0x1], 1 }
  0x70   :  { %213 = vsyncpa [#allocation6], 1 }
  0x71   :  { %214 = vsyncpa [#allocation4], 1 }
  0x72   :  { %216 = vsyncpa [#allocation4 + $0x1], 1 }

</bundles_post_ra>
